<compile_context>
chip_gen: v6e
topology: v6e:2x2x1
jax: 0.10.0
libtpu: 0.0.40
codegen_flags: <defaults>
</compile_context>

<pallas_src>
import functools

import jax
import jax.numpy as jnp
import numpy as np
from jax.experimental import pallas as pl
from jax.experimental.pallas import tpu as pltpu

_EPS = 1e-5  # SignSensitiveBatchNorm1d.eps


def brnn_kernel(gates_ref,      # SMEM (T,)      per-step gate scalars
                x_ref,          # VMEM (T*B, I)  full input sequence, 2-D lane-dense (f32)
                w_in_ref,       # VMEM (I, H)    sign(InputLinear.weight)^T, bf16
                w_hid_ref,      # VMEM (H, H)    sign(hiddenLinear.weight)^T, bf16
                w_out_ref,      # VMEM (H, O)    sign(outputLinear.weight)^T, bf16
                l2_ref,         # VMEM (1, H)    SignSensitiveBN l2 (f32)
                ldiff_ref,      # VMEM (1, H)    l1 - l2 (f32)
                inv_std_ref,    # VMEM (1, H)    1/sqrt(running_var+eps) (batch==1 path)
                out_ref,        # VMEM (B, O)    final-step output
                xw_ref,         # VMEM (T*B, H)  scratch: hoisted input projection
                *, seq_len, batch_size, eps):
    # Sign weights are exact in bf16; upcast ONCE per kernel call so all recurrence math
    # is plain f32 (bf16 activations would interact badly with the BN 1/sqrt(var+eps)
    # amplification).
    w_hid = w_hid_ref[...].astype(jnp.float32)          # (H, H)
    l2 = l2_ref[...]                                    # (1, H)
    ldiff = ldiff_ref[...]                              # (1, H)
    hidden_size = w_hid.shape[0]

    # Hoisted input projection: ONE MXU matmul off the serial h-dependency chain instead
    # of T dependent matmul round trips inside the loop.
    xw_ref[...] = jnp.dot(x_ref[...], w_in_ref[...].astype(jnp.float32),
                          preferred_element_type=jnp.float32)      # (T*B, H)

    if batch_size == 1:
        inv_std_const = inv_std_ref[...]                # (1, H)
    else:
        inv_n = 1.0 / float(batch_size)
        inv_nm1 = 1.0 / float(batch_size - 1)           # torch.var(dim=0) is unbiased

    def step(t, h_prev):
        g = gates_ref[t]                                # scalar gate for this step (SMEM)
        xw_t = xw_ref[pl.ds(t * batch_size, batch_size), :]        # (B, H) precomputed x@W_in

        # hidden = InputLinear(x_t) + gates[t] * hiddenLinear(h_prev);   Hardtanh
        pre = xw_t + g * jnp.dot(h_prev, w_hid, preferred_element_type=jnp.float32)
        hidden = jnp.clip(pre, -1.0, 1.0)

        # SignSensitiveBatchNorm1d:
        #   top = h*sig(10h)*l1 + h*sig(-10h)*l2 == h*(l2 + sig(10h)*(l1-l2))
        s = jax.nn.sigmoid(10.0 * hidden)
        top = hidden * (l2 + s * ldiff)

        if batch_size > 1:
            # Two independent reductions (sum, sum of squares) -> unbiased variance.
            s1 = jnp.sum(hidden, axis=0, keepdims=True)
            s2 = jnp.sum(hidden * hidden, axis=0, keepdims=True)
            var = (s2 - s1 * s1 * inv_n) * inv_nm1
            inv_std = jax.lax.rsqrt(var + eps)
        else:
            inv_std = inv_std_const
        return top * inv_std                            # new hidden state (B, H)

    # hiddenOutput starts at zero (torch broadcasts a (1,H) zero; identical result).
    h0 = jnp.zeros((batch_size, hidden_size), jnp.float32)
    h_last = jax.lax.fori_loop(0, seq_len, step, h0,
                               unroll=True if seq_len <= 64 else 8)

    # Net only consumes out[-1]: project and store exactly once.
    out_ref[...] = jnp.dot(h_last, w_out_ref[...].astype(jnp.float32),
                           preferred_element_type=jnp.float32).astype(out_ref.dtype)


def prepare_params(params):
    """One-time parameter prep (hoisted out of the per-call path; weights are static).

    BinarizeLinear re-signs the stored .org weight every forward, so sign(weight) is what
    every forward uses.  +-1/0 are exact in bf16 -> half the weight HBM->VMEM bytes.
    """
    w_in = jnp.sign(jnp.asarray(params["w_in"], jnp.float32)).T.astype(jnp.bfloat16)    # (I, H)
    w_hid = jnp.sign(jnp.asarray(params["w_hid"], jnp.float32)).T.astype(jnp.bfloat16)  # (H, H)
    w_out = jnp.sign(jnp.asarray(params["w_out"], jnp.float32)).T.astype(jnp.bfloat16)  # (H, O)
    H = w_in.shape[1]
    l1 = jnp.asarray(params["l1"], jnp.float32).reshape(1, H)
    l2 = jnp.asarray(params["l2"], jnp.float32).reshape(1, H)
    # batch==1 inference path of SignSensitiveBN: 1/sqrt(running_var + eps), precomputed.
    inv_std1 = jax.lax.rsqrt(
        jnp.asarray(params["running_var"], jnp.float32).reshape(1, H) + _EPS)
    return {
        "gates": jnp.asarray(params["gates"], jnp.float32),
        "w_in": w_in, "w_hid": w_hid, "w_out": w_out,
        "l2": l2, "l_diff": l1 - l2, "inv_std1": inv_std1,
    }


@jax.jit
def net_forward(x, prep):
    """x: (seq, batch, inputSize) float32.  Returns (batch, outputSize) == Net's x[-1]."""
    T, B, I = x.shape
    x2d = jnp.asarray(x, jnp.float32).reshape(T * B, I)   # dense 2-D layout (no per-step tile pad)
    H = prep["w_in"].shape[1]
    O = prep["w_out"].shape[1]

    kernel = functools.partial(brnn_kernel, seq_len=T, batch_size=B, eps=_EPS)

    # Everything is VMEM-resident once (no grid => no double buffering).  Budget the
    # scoped VMEM explicitly; cap below v7x's 64 MiB physical VMEM to leave headroom
    # for Mosaic internal scratch.
    total_bytes = (T * B * I * 4                     # x
                   + T * B * H * 4                   # xw scratch
                   + (I * H + H * H + H * O) * 2     # bf16 sign weights
                   + 3 * H * 4                       # l2, l_diff, inv_std
                   + B * O * 4)                      # output
    vmem_limit = int(min(48 * 1024 * 1024, max(4 * 1024 * 1024, 4 * total_bytes)))

    vmem = pltpu.MemorySpace.VMEM
    out = pl.pallas_call(
        kernel,
        out_shape=jax.ShapeDtypeStruct((B, O), jnp.float32),
        in_specs=[
            pl.BlockSpec(memory_space=pltpu.MemorySpace.SMEM),   # gates (T,)
            pl.BlockSpec(memory_space=vmem),                     # x2d (T*B, I)
            pl.BlockSpec(memory_space=vmem),                     # w_in^T  (bf16)
            pl.BlockSpec(memory_space=vmem),                     # w_hid^T (bf16)
            pl.BlockSpec(memory_space=vmem),                     # w_out^T (bf16)
            pl.BlockSpec(memory_space=vmem),                     # l2
            pl.BlockSpec(memory_space=vmem),                     # l1 - l2
            pl.BlockSpec(memory_space=vmem),                     # inv_std (running_var path)
        ],
        out_specs=pl.BlockSpec(memory_space=vmem),
        scratch_shapes=[pltpu.VMEM((T * B, H), jnp.float32)],    # hoisted x @ W_in
        compiler_params=pltpu.CompilerParams(vmem_limit_bytes=vmem_limit),
    )(prep["gates"], x2d, prep["w_in"], prep["w_hid"], prep["w_out"],
      prep["l2"], prep["l_diff"], prep["inv_std1"])

    return out                                                   # (B, O) == Net's x[-1]


def net_forward_ref(x, params, eps=_EPS):
    """Pure-JAX f32 reference matching the PyTorch module semantics."""
    T, B, _ = x.shape
    w_in = jnp.sign(jnp.asarray(params["w_in"], jnp.float32))
    w_hid = jnp.sign(jnp.asarray(params["w_hid"], jnp.float32))
    w_out = jnp.sign(jnp.asarray(params["w_out"], jnp.float32))
    gates = jnp.asarray(params["gates"], jnp.float32)
    l1 = jnp.asarray(params["l1"], jnp.float32)
    l2 = jnp.asarray(params["l2"], jnp.float32)
    rvar = jnp.asarray(params["running_var"], jnp.float32)
    H = w_in.shape[0]
    h = jnp.zeros((B, H), jnp.float32)
    for t in range(T):
        pre = x[t] @ w_in.T + gates[t] * (h @ w_hid.T)
        hid = jnp.clip(pre, -1.0, 1.0)
        top = hid * jax.nn.sigmoid(10.0 * hid) * l1 + hid * jax.nn.sigmoid(-10.0 * hid) * l2
        if B > 1:
            var = jnp.var(hid, axis=0, keepdims=True, ddof=1)
            bottom = jnp.sqrt(var + eps)
        else:
            bottom = jnp.sqrt(rvar + eps)
        h = top / bottom
    return h @ w_out.T


def init_params(key, input_size, hidden_size, output_size, n_iters):
    """Parameter shapes mirroring the module's __init__ (trainable params get random
    values so the gate / l1 / l2 paths are actually exercised)."""
    k_in, k_out, k_g, k_l1, k_l2 = jax.random.split(key, 5)
    b_in = 1.0 / np.sqrt(input_size)
    b_out = 1.0 / np.sqrt(hidden_size)
    return {
        "w_in": jax.random.uniform(k_in, (hidden_size, input_size),
                                   jnp.float32, -b_in, b_in),
        "w_hid": jnp.eye(hidden_size, dtype=jnp.float32),   # module sets eye; sign(eye)==eye
        "w_out": jax.random.uniform(k_out, (output_size, hidden_size),
                                    jnp.float32, -b_out, b_out),
        "gates": jax.random.uniform(k_g, (n_iters,), jnp.float32, 0.5, 1.5),
        "l1": jax.random.uniform(k_l1, (hidden_size,), jnp.float32, 0.5, 1.5),
        "l2": jax.random.uniform(k_l2, (hidden_size,), jnp.float32, 0.5, 1.5),
        "running_var": jnp.ones((1, hidden_size), jnp.float32),
    }


if __name__ == "__main__":
    # Small shapes consistent with Net(inputSize=2, outputSize=5, hiddenSize=..., n_iters=...)
    SEQ, BATCH, IN, HID, OUT = 8, 2, 2, 32, 5

    key = jax.random.PRNGKey(0)
    k_x, k_p = jax.random.split(key)
    x = jax.random.normal(k_x, (SEQ, BATCH, IN), jnp.float32)
    params = init_params(k_p, IN, HID, OUT, SEQ)

    prep = prepare_params(params)                   # one-time: sign/transpose/bf16 + inv_std
    y = jax.block_until_ready(net_forward(x, prep))
    y_ref = jax.block_until_ready(net_forward_ref(x, params))

    assert y.shape == (BATCH, OUT)
    # The BN divides by sqrt(var + 1e-5); when the batch variance collapses this amplifies
    # tiny rounding differences, so use a modest tolerance vs. the f32 reference.
    np.testing.assert_allclose(np.asarray(y), np.asarray(y_ref), rtol=1e-2, atol=1e-2)

    print("KERNEL_OK")
</pallas_src>

<mosaic_0001>
module attributes {stable_mosaic.version = 11 : i64} {
  func.func @brnn_kernel(%arg0: memref<8xf32, #tpu.memory_space<smem>>, %arg1: memref<16x2xf32, #tpu.memory_space<vmem>>, %arg2: memref<2x32xbf16, #tpu.memory_space<vmem>>, %arg3: memref<32x32xbf16, #tpu.memory_space<vmem>>, %arg4: memref<32x5xbf16, #tpu.memory_space<vmem>>, %arg5: memref<1x32xf32, #tpu.memory_space<vmem>>, %arg6: memref<1x32xf32, #tpu.memory_space<vmem>>, %arg7: memref<1x32xf32, #tpu.memory_space<vmem>>, %arg8: memref<2x5xf32, #tpu.memory_space<vmem>>, %arg9: memref<16x32xf32, #tpu.memory_space<vmem>>) attributes {dimension_semantics = [], scalar_prefetch = 0 : i64, scratch_operands = 1 : i64, tpu.core_type = #tpu.core_type<tc>} {
    %c0 = arith.constant 0 : index
    %c0_0 = arith.constant 0 : index
    %0 = vector.load %arg3[%c0, %c0_0] : memref<32x32xbf16, #tpu.memory_space<vmem>>, vector<32x32xbf16>
    %1 = arith.extf %0 : vector<32x32xbf16> to vector<32x32xf32>
    %c0_1 = arith.constant 0 : index
    %c0_2 = arith.constant 0 : index
    %2 = vector.load %arg5[%c0_1, %c0_2] : memref<1x32xf32, #tpu.memory_space<vmem>>, vector<1x32xf32>
    %c0_3 = arith.constant 0 : index
    %c0_4 = arith.constant 0 : index
    %3 = vector.load %arg6[%c0_3, %c0_4] : memref<1x32xf32, #tpu.memory_space<vmem>>, vector<1x32xf32>
    %c0_5 = arith.constant 0 : index
    %c0_6 = arith.constant 0 : index
    %4 = vector.load %arg1[%c0_5, %c0_6] : memref<16x2xf32, #tpu.memory_space<vmem>>, vector<16x2xf32>
    %c0_7 = arith.constant 0 : index
    %c0_8 = arith.constant 0 : index
    %5 = vector.load %arg2[%c0_7, %c0_8] : memref<2x32xbf16, #tpu.memory_space<vmem>>, vector<2x32xbf16>
    %6 = arith.extf %5 : vector<2x32xbf16> to vector<2x32xf32>
    %cst = arith.constant dense<0.000000e+00> : vector<16x32xf32>
    %7 = tpu.matmul %4, %6, %cst {dimension_numbers = #tpu.dot_dimension_numbers<[1], [0], [0], [1], [0, 0, 1, 1], [], []>} : vector<16x2xf32>, vector<2x32xf32>, vector<16x32xf32> -> vector<16x32xf32>
    %c0_9 = arith.constant 0 : index
    %c0_10 = arith.constant 0 : index
    %8 = vector.load %arg9[%c0_9, %c0_10] : memref<16x32xf32, #tpu.memory_space<vmem>>, vector<16x32xf32>
    tpu.vector_store %arg9[%c0_9, %c0_10], %7 {strides = array<i32>} : memref<16x32xf32, #tpu.memory_space<vmem>>, vector<16x32xf32>,
    %cst_11 = arith.constant 0.000000e+00 : f32
    %9 = vector.broadcast %cst_11 : f32 to vector<2x32xf32>
    %c0_i32 = arith.constant 0 : i32
    %10 = arith.index_cast %c0_i32 : i32 to index
    %11 = memref.load %arg0[%10] : memref<8xf32, #tpu.memory_space<smem>>
    %c2_i32 = arith.constant 2 : i32
    %12 = arith.muli %c0_i32, %c2_i32 : i32
    %13 = arith.index_cast %12 : i32 to index
    %c0_12 = arith.constant 0 : index
    %14 = vector.load %arg9[%13, %c0_12] : memref<16x32xf32, #tpu.memory_space<vmem>>, vector<2x32xf32>
    %cst_13 = arith.constant dense<0.000000e+00> : vector<2x32xf32>
    %15 = tpu.matmul %9, %1, %cst_13 {dimension_numbers = #tpu.dot_dimension_numbers<[1], [0], [0], [1], [0, 0, 1, 1], [], []>} : vector<2x32xf32>, vector<32x32xf32>, vector<2x32xf32> -> vector<2x32xf32>
    %16 = vector.broadcast %11 : f32 to vector<2x32xf32>
    %17 = arith.mulf %16, %15 : vector<2x32xf32>
    %18 = arith.addf %14, %17 : vector<2x32xf32>
    %cst_14 = arith.constant -1.000000e+00 : f32
    %cst_15 = arith.constant 1.000000e+00 : f32
    %19 = vector.broadcast %cst_14 : f32 to vector<2x32xf32>
    %20 = arith.maximumf %19, %18 : vector<2x32xf32>
    %21 = vector.broadcast %cst_15 : f32 to vector<2x32xf32>
    %22 = arith.minimumf %21, %20 : vector<2x32xf32>
    %cst_16 = arith.constant 1.000000e+01 : f32
    %23 = vector.broadcast %cst_16 : f32 to vector<2x32xf32>
    %24 = arith.mulf %23, %22 : vector<2x32xf32>
    %25 = arith.negf %24 : vector<2x32xf32>
    %26 = math.exp %25 : vector<2x32xf32>
    %cst_17 = arith.constant 1.000000e+00 : f32
    %27 = vector.broadcast %cst_17 : f32 to vector<2x32xf32>
    %28 = arith.addf %27, %26 : vector<2x32xf32>
    %29 = arith.divf %27, %28 : vector<2x32xf32>
    %30 = vector.broadcast %3 : vector<1x32xf32> to vector<2x32xf32>
    %31 = arith.mulf %29, %30 : vector<2x32xf32>
    %32 = vector.broadcast %2 : vector<1x32xf32> to vector<2x32xf32>
    %33 = arith.addf %32, %31 : vector<2x32xf32>
    %34 = arith.mulf %22, %33 : vector<2x32xf32>
    %cst_18 = arith.constant dense<0.000000e+00> : vector<32xf32>
    %35 = vector.multi_reduction <add>, %22, %cst_18 [0] : vector<2x32xf32> to vector<32xf32>
    %36 = vector.shape_cast %35 : vector<32xf32> to vector<1x32xf32>
    %37 = arith.mulf %22, %22 : vector<2x32xf32>
    %cst_19 = arith.constant dense<0.000000e+00> : vector<32xf32>
    %38 = vector.multi_reduction <add>, %37, %cst_19 [0] : vector<2x32xf32> to vector<32xf32>
    %39 = vector.shape_cast %38 : vector<32xf32> to vector<1x32xf32>
    %40 = arith.mulf %36, %36 : vector<1x32xf32>
    %cst_20 = arith.constant 5.000000e-01 : f32
    %41 = vector.broadcast %cst_20 : f32 to vector<1x32xf32>
    %42 = arith.mulf %40, %41 : vector<1x32xf32>
    %43 = arith.subf %39, %42 : vector<1x32xf32>
    %cst_21 = arith.constant 1.000000e+00 : f32
    %44 = vector.broadcast %cst_21 : f32 to vector<1x32xf32>
    %45 = arith.mulf %43, %44 : vector<1x32xf32>
    %cst_22 = arith.constant 9.99999974E-6 : f32
    %46 = vector.broadcast %cst_22 : f32 to vector<1x32xf32>
    %47 = arith.addf %45, %46 : vector<1x32xf32>
    %48 = math.rsqrt %47 : vector<1x32xf32>
    %49 = vector.broadcast %48 : vector<1x32xf32> to vector<2x32xf32>
    %50 = arith.mulf %34, %49 : vector<2x32xf32>
    %c1_i32 = arith.constant 1 : i32
    %51 = arith.index_cast %c1_i32 : i32 to index
    %52 = memref.load %arg0[%51] : memref<8xf32, #tpu.memory_space<smem>>
    %c2_i32_23 = arith.constant 2 : i32
    %53 = arith.muli %c1_i32, %c2_i32_23 : i32
    %54 = arith.index_cast %53 : i32 to index
    %c0_24 = arith.constant 0 : index
    %55 = vector.load %arg9[%54, %c0_24] : memref<16x32xf32, #tpu.memory_space<vmem>>, vector<2x32xf32>
    %cst_25 = arith.constant dense<0.000000e+00> : vector<2x32xf32>
    %56 = tpu.matmul %50, %1, %cst_25 {dimension_numbers = #tpu.dot_dimension_numbers<[1], [0], [0], [1], [0, 0, 1, 1], [], []>} : vector<2x32xf32>, vector<32x32xf32>, vector<2x32xf32> -> vector<2x32xf32>
    %57 = vector.broadcast %52 : f32 to vector<2x32xf32>
    %58 = arith.mulf %57, %56 : vector<2x32xf32>
    %59 = arith.addf %55, %58 : vector<2x32xf32>
    %cst_26 = arith.constant -1.000000e+00 : f32
    %cst_27 = arith.constant 1.000000e+00 : f32
    %60 = vector.broadcast %cst_26 : f32 to vector<2x32xf32>
    %61 = arith.maximumf %60, %59 : vector<2x32xf32>
    %62 = vector.broadcast %cst_27 : f32 to vector<2x32xf32>
    %63 = arith.minimumf %62, %61 : vector<2x32xf32>
    %cst_28 = arith.constant 1.000000e+01 : f32
    %64 = vector.broadcast %cst_28 : f32 to vector<2x32xf32>
    %65 = arith.mulf %64, %63 : vector<2x32xf32>
    %66 = arith.negf %65 : vector<2x32xf32>
    %67 = math.exp %66 : vector<2x32xf32>
    %cst_29 = arith.constant 1.000000e+00 : f32
    %68 = vector.broadcast %cst_29 : f32 to vector<2x32xf32>
    %69 = arith.addf %68, %67 : vector<2x32xf32>
    %70 = arith.divf %68, %69 : vector<2x32xf32>
    %71 = vector.broadcast %3 : vector<1x32xf32> to vector<2x32xf32>
    %72 = arith.mulf %70, %71 : vector<2x32xf32>
    %73 = vector.broadcast %2 : vector<1x32xf32> to vector<2x32xf32>
    %74 = arith.addf %73, %72 : vector<2x32xf32>
    %75 = arith.mulf %63, %74 : vector<2x32xf32>
    %cst_30 = arith.constant dense<0.000000e+00> : vector<32xf32>
    %76 = vector.multi_reduction <add>, %63, %cst_30 [0] : vector<2x32xf32> to vector<32xf32>
    %77 = vector.shape_cast %76 : vector<32xf32> to vector<1x32xf32>
    %78 = arith.mulf %63, %63 : vector<2x32xf32>
    %cst_31 = arith.constant dense<0.000000e+00> : vector<32xf32>
    %79 = vector.multi_reduction <add>, %78, %cst_31 [0] : vector<2x32xf32> to vector<32xf32>
    %80 = vector.shape_cast %79 : vector<32xf32> to vector<1x32xf32>
    %81 = arith.mulf %77, %77 : vector<1x32xf32>
    %cst_32 = arith.constant 5.000000e-01 : f32
    %82 = vector.broadcast %cst_32 : f32 to vector<1x32xf32>
    %83 = arith.mulf %81, %82 : vector<1x32xf32>
    %84 = arith.subf %80, %83 : vector<1x32xf32>
    %cst_33 = arith.constant 1.000000e+00 : f32
    %85 = vector.broadcast %cst_33 : f32 to vector<1x32xf32>
    %86 = arith.mulf %84, %85 : vector<1x32xf32>
    %cst_34 = arith.constant 9.99999974E-6 : f32
    %87 = vector.broadcast %cst_34 : f32 to vector<1x32xf32>
    %88 = arith.addf %86, %87 : vector<1x32xf32>
    %89 = math.rsqrt %88 : vector<1x32xf32>
    %90 = vector.broadcast %89 : vector<1x32xf32> to vector<2x32xf32>
    %91 = arith.mulf %75, %90 : vector<2x32xf32>
    %c2_i32_35 = arith.constant 2 : i32
    %92 = arith.index_cast %c2_i32_35 : i32 to index
    %93 = memref.load %arg0[%92] : memref<8xf32, #tpu.memory_space<smem>>
    %c2_i32_36 = arith.constant 2 : i32
    %94 = arith.muli %c2_i32_35, %c2_i32_36 : i32
    %95 = arith.index_cast %94 : i32 to index
    %c0_37 = arith.constant 0 : index
    %96 = vector.load %arg9[%95, %c0_37] : memref<16x32xf32, #tpu.memory_space<vmem>>, vector<2x32xf32>
    %cst_38 = arith.constant dense<0.000000e+00> : vector<2x32xf32>
    %97 = tpu.matmul %91, %1, %cst_38 {dimension_numbers = #tpu.dot_dimension_numbers<[1], [0], [0], [1], [0, 0, 1, 1], [], []>} : vector<2x32xf32>, vector<32x32xf32>, vector<2x32xf32> -> vector<2x32xf32>
    %98 = vector.broadcast %93 : f32 to vector<2x32xf32>
    %99 = arith.mulf %98, %97 : vector<2x32xf32>
    %100 = arith.addf %96, %99 : vector<2x32xf32>
    %cst_39 = arith.constant -1.000000e+00 : f32
    %cst_40 = arith.constant 1.000000e+00 : f32
    %101 = vector.broadcast %cst_39 : f32 to vector<2x32xf32>
    %102 = arith.maximumf %101, %100 : vector<2x32xf32>
    %103 = vector.broadcast %cst_40 : f32 to vector<2x32xf32>
    %104 = arith.minimumf %103, %102 : vector<2x32xf32>
    %cst_41 = arith.constant 1.000000e+01 : f32
    %105 = vector.broadcast %cst_41 : f32 to vector<2x32xf32>
    %106 = arith.mulf %105, %104 : vector<2x32xf32>
    %107 = arith.negf %106 : vector<2x32xf32>
    %108 = math.exp %107 : vector<2x32xf32>
    %cst_42 = arith.constant 1.000000e+00 : f32
    %109 = vector.broadcast %cst_42 : f32 to vector<2x32xf32>
    %110 = arith.addf %109, %108 : vector<2x32xf32>
    %111 = arith.divf %109, %110 : vector<2x32xf32>
    %112 = vector.broadcast %3 : vector<1x32xf32> to vector<2x32xf32>
    %113 = arith.mulf %111, %112 : vector<2x32xf32>
    %114 = vector.broadcast %2 : vector<1x32xf32> to vector<2x32xf32>
    %115 = arith.addf %114, %113 : vector<2x32xf32>
    %116 = arith.mulf %104, %115 : vector<2x32xf32>
    %cst_43 = arith.constant dense<0.000000e+00> : vector<32xf32>
    %117 = vector.multi_reduction <add>, %104, %cst_43 [0] : vector<2x32xf32> to vector<32xf32>
    %118 = vector.shape_cast %117 : vector<32xf32> to vector<1x32xf32>
    %119 = arith.mulf %104, %104 : vector<2x32xf32>
    %cst_44 = arith.constant dense<0.000000e+00> : vector<32xf32>
    %120 = vector.multi_reduction <add>, %119, %cst_44 [0] : vector<2x32xf32> to vector<32xf32>
    %121 = vector.shape_cast %120 : vector<32xf32> to vector<1x32xf32>
    %122 = arith.mulf %118, %118 : vector<1x32xf32>
    %cst_45 = arith.constant 5.000000e-01 : f32
    %123 = vector.broadcast %cst_45 : f32 to vector<1x32xf32>
    %124 = arith.mulf %122, %123 : vector<1x32xf32>
    %125 = arith.subf %121, %124 : vector<1x32xf32>
    %cst_46 = arith.constant 1.000000e+00 : f32
    %126 = vector.broadcast %cst_46 : f32 to vector<1x32xf32>
    %127 = arith.mulf %125, %126 : vector<1x32xf32>
    %cst_47 = arith.constant 9.99999974E-6 : f32
    %128 = vector.broadcast %cst_47 : f32 to vector<1x32xf32>
    %129 = arith.addf %127, %128 : vector<1x32xf32>
    %130 = math.rsqrt %129 : vector<1x32xf32>
    %131 = vector.broadcast %130 : vector<1x32xf32> to vector<2x32xf32>
    %132 = arith.mulf %116, %131 : vector<2x32xf32>
    %c3_i32 = arith.constant 3 : i32
    %133 = arith.index_cast %c3_i32 : i32 to index
    %134 = memref.load %arg0[%133] : memref<8xf32, #tpu.memory_space<smem>>
    %c2_i32_48 = arith.constant 2 : i32
    %135 = arith.muli %c3_i32, %c2_i32_48 : i32
    %136 = arith.index_cast %135 : i32 to index
    %c0_49 = arith.constant 0 : index
    %137 = vector.load %arg9[%136, %c0_49] : memref<16x32xf32, #tpu.memory_space<vmem>>, vector<2x32xf32>
    %cst_50 = arith.constant dense<0.000000e+00> : vector<2x32xf32>
    %138 = tpu.matmul %132, %1, %cst_50 {dimension_numbers = #tpu.dot_dimension_numbers<[1], [0], [0], [1], [0, 0, 1, 1], [], []>} : vector<2x32xf32>, vector<32x32xf32>, vector<2x32xf32> -> vector<2x32xf32>
    %139 = vector.broadcast %134 : f32 to vector<2x32xf32>
    %140 = arith.mulf %139, %138 : vector<2x32xf32>
    %141 = arith.addf %137, %140 : vector<2x32xf32>
    %cst_51 = arith.constant -1.000000e+00 : f32
    %cst_52 = arith.constant 1.000000e+00 : f32
    %142 = vector.broadcast %cst_51 : f32 to vector<2x32xf32>
    %143 = arith.maximumf %142, %141 : vector<2x32xf32>
    %144 = vector.broadcast %cst_52 : f32 to vector<2x32xf32>
    %145 = arith.minimumf %144, %143 : vector<2x32xf32>
    %cst_53 = arith.constant 1.000000e+01 : f32
    %146 = vector.broadcast %cst_53 : f32 to vector<2x32xf32>
    %147 = arith.mulf %146, %145 : vector<2x32xf32>
    %148 = arith.negf %147 : vector<2x32xf32>
    %149 = math.exp %148 : vector<2x32xf32>
    %cst_54 = arith.constant 1.000000e+00 : f32
    %150 = vector.broadcast %cst_54 : f32 to vector<2x32xf32>
    %151 = arith.addf %150, %149 : vector<2x32xf32>
    %152 = arith.divf %150, %151 : vector<2x32xf32>
    %153 = vector.broadcast %3 : vector<1x32xf32> to vector<2x32xf32>
    %154 = arith.mulf %152, %153 : vector<2x32xf32>
    %155 = vector.broadcast %2 : vector<1x32xf32> to vector<2x32xf32>
    %156 = arith.addf %155, %154 : vector<2x32xf32>
    %157 = arith.mulf %145, %156 : vector<2x32xf32>
    %cst_55 = arith.constant dense<0.000000e+00> : vector<32xf32>
    %158 = vector.multi_reduction <add>, %145, %cst_55 [0] : vector<2x32xf32> to vector<32xf32>
    %159 = vector.shape_cast %158 : vector<32xf32> to vector<1x32xf32>
    %160 = arith.mulf %145, %145 : vector<2x32xf32>
    %cst_56 = arith.constant dense<0.000000e+00> : vector<32xf32>
    %161 = vector.multi_reduction <add>, %160, %cst_56 [0] : vector<2x32xf32> to vector<32xf32>
    %162 = vector.shape_cast %161 : vector<32xf32> to vector<1x32xf32>
    %163 = arith.mulf %159, %159 : vector<1x32xf32>
    %cst_57 = arith.constant 5.000000e-01 : f32
    %164 = vector.broadcast %cst_57 : f32 to vector<1x32xf32>
    %165 = arith.mulf %163, %164 : vector<1x32xf32>
    %166 = arith.subf %162, %165 : vector<1x32xf32>
    %cst_58 = arith.constant 1.000000e+00 : f32
    %167 = vector.broadcast %cst_58 : f32 to vector<1x32xf32>
    %168 = arith.mulf %166, %167 : vector<1x32xf32>
    %cst_59 = arith.constant 9.99999974E-6 : f32
    %169 = vector.broadcast %cst_59 : f32 to vector<1x32xf32>
    %170 = arith.addf %168, %169 : vector<1x32xf32>
    %171 = math.rsqrt %170 : vector<1x32xf32>
    %172 = vector.broadcast %171 : vector<1x32xf32> to vector<2x32xf32>
    %173 = arith.mulf %157, %172 : vector<2x32xf32>
    %c4_i32 = arith.constant 4 : i32
    %174 = arith.index_cast %c4_i32 : i32 to index
    %175 = memref.load %arg0[%174] : memref<8xf32, #tpu.memory_space<smem>>
    %c2_i32_60 = arith.constant 2 : i32
    %176 = arith.muli %c4_i32, %c2_i32_60 : i32
    %177 = arith.index_cast %176 : i32 to index
    %c0_61 = arith.constant 0 : index
    %178 = vector.load %arg9[%177, %c0_61] : memref<16x32xf32, #tpu.memory_space<vmem>>, vector<2x32xf32>
    %cst_62 = arith.constant dense<0.000000e+00> : vector<2x32xf32>
    %179 = tpu.matmul %173, %1, %cst_62 {dimension_numbers = #tpu.dot_dimension_numbers<[1], [0], [0], [1], [0, 0, 1, 1], [], []>} : vector<2x32xf32>, vector<32x32xf32>, vector<2x32xf32> -> vector<2x32xf32>
    %180 = vector.broadcast %175 : f32 to vector<2x32xf32>
    %181 = arith.mulf %180, %179 : vector<2x32xf32>
    %182 = arith.addf %178, %181 : vector<2x32xf32>
    %cst_63 = arith.constant -1.000000e+00 : f32
    %cst_64 = arith.constant 1.000000e+00 : f32
    %183 = vector.broadcast %cst_63 : f32 to vector<2x32xf32>
    %184 = arith.maximumf %183, %182 : vector<2x32xf32>
    %185 = vector.broadcast %cst_64 : f32 to vector<2x32xf32>
    %186 = arith.minimumf %185, %184 : vector<2x32xf32>
    %cst_65 = arith.constant 1.000000e+01 : f32
    %187 = vector.broadcast %cst_65 : f32 to vector<2x32xf32>
    %188 = arith.mulf %187, %186 : vector<2x32xf32>
    %189 = arith.negf %188 : vector<2x32xf32>
    %190 = math.exp %189 : vector<2x32xf32>
    %cst_66 = arith.constant 1.000000e+00 : f32
    %191 = vector.broadcast %cst_66 : f32 to vector<2x32xf32>
    %192 = arith.addf %191, %190 : vector<2x32xf32>
    %193 = arith.divf %191, %192 : vector<2x32xf32>
    %194 = vector.broadcast %3 : vector<1x32xf32> to vector<2x32xf32>
    %195 = arith.mulf %193, %194 : vector<2x32xf32>
    %196 = vector.broadcast %2 : vector<1x32xf32> to vector<2x32xf32>
    %197 = arith.addf %196, %195 : vector<2x32xf32>
    %198 = arith.mulf %186, %197 : vector<2x32xf32>
    %cst_67 = arith.constant dense<0.000000e+00> : vector<32xf32>
    %199 = vector.multi_reduction <add>, %186, %cst_67 [0] : vector<2x32xf32> to vector<32xf32>
    %200 = vector.shape_cast %199 : vector<32xf32> to vector<1x32xf32>
    %201 = arith.mulf %186, %186 : vector<2x32xf32>
    %cst_68 = arith.constant dense<0.000000e+00> : vector<32xf32>
    %202 = vector.multi_reduction <add>, %201, %cst_68 [0] : vector<2x32xf32> to vector<32xf32>
    %203 = vector.shape_cast %202 : vector<32xf32> to vector<1x32xf32>
    %204 = arith.mulf %200, %200 : vector<1x32xf32>
    %cst_69 = arith.constant 5.000000e-01 : f32
    %205 = vector.broadcast %cst_69 : f32 to vector<1x32xf32>
    %206 = arith.mulf %204, %205 : vector<1x32xf32>
    %207 = arith.subf %203, %206 : vector<1x32xf32>
    %cst_70 = arith.constant 1.000000e+00 : f32
    %208 = vector.broadcast %cst_70 : f32 to vector<1x32xf32>
    %209 = arith.mulf %207, %208 : vector<1x32xf32>
    %cst_71 = arith.constant 9.99999974E-6 : f32
    %210 = vector.broadcast %cst_71 : f32 to vector<1x32xf32>
    %211 = arith.addf %209, %210 : vector<1x32xf32>
    %212 = math.rsqrt %211 : vector<1x32xf32>
    %213 = vector.broadcast %212 : vector<1x32xf32> to vector<2x32xf32>
    %214 = arith.mulf %198, %213 : vector<2x32xf32>
    %c5_i32 = arith.constant 5 : i32
    %215 = arith.index_cast %c5_i32 : i32 to index
    %216 = memref.load %arg0[%215] : memref<8xf32, #tpu.memory_space<smem>>
    %c2_i32_72 = arith.constant 2 : i32
    %217 = arith.muli %c5_i32, %c2_i32_72 : i32
    %218 = arith.index_cast %217 : i32 to index
    %c0_73 = arith.constant 0 : index
    %219 = vector.load %arg9[%218, %c0_73] : memref<16x32xf32, #tpu.memory_space<vmem>>, vector<2x32xf32>
    %cst_74 = arith.constant dense<0.000000e+00> : vector<2x32xf32>
    %220 = tpu.matmul %214, %1, %cst_74 {dimension_numbers = #tpu.dot_dimension_numbers<[1], [0], [0], [1], [0, 0, 1, 1], [], []>} : vector<2x32xf32>, vector<32x32xf32>, vector<2x32xf32> -> vector<2x32xf32>
    %221 = vector.broadcast %216 : f32 to vector<2x32xf32>
    %222 = arith.mulf %221, %220 : vector<2x32xf32>
    %223 = arith.addf %219, %222 : vector<2x32xf32>
    %cst_75 = arith.constant -1.000000e+00 : f32
    %cst_76 = arith.constant 1.000000e+00 : f32
    %224 = vector.broadcast %cst_75 : f32 to vector<2x32xf32>
    %225 = arith.maximumf %224, %223 : vector<2x32xf32>
    %226 = vector.broadcast %cst_76 : f32 to vector<2x32xf32>
    %227 = arith.minimumf %226, %225 : vector<2x32xf32>
    %cst_77 = arith.constant 1.000000e+01 : f32
    %228 = vector.broadcast %cst_77 : f32 to vector<2x32xf32>
    %229 = arith.mulf %228, %227 : vector<2x32xf32>
    %230 = arith.negf %229 : vector<2x32xf32>
    %231 = math.exp %230 : vector<2x32xf32>
    %cst_78 = arith.constant 1.000000e+00 : f32
    %232 = vector.broadcast %cst_78 : f32 to vector<2x32xf32>
    %233 = arith.addf %232, %231 : vector<2x32xf32>
    %234 = arith.divf %232, %233 : vector<2x32xf32>
    %235 = vector.broadcast %3 : vector<1x32xf32> to vector<2x32xf32>
    %236 = arith.mulf %234, %235 : vector<2x32xf32>
    %237 = vector.broadcast %2 : vector<1x32xf32> to vector<2x32xf32>
    %238 = arith.addf %237, %236 : vector<2x32xf32>
    %239 = arith.mulf %227, %238 : vector<2x32xf32>
    %cst_79 = arith.constant dense<0.000000e+00> : vector<32xf32>
    %240 = vector.multi_reduction <add>, %227, %cst_79 [0] : vector<2x32xf32> to vector<32xf32>
    %241 = vector.shape_cast %240 : vector<32xf32> to vector<1x32xf32>
    %242 = arith.mulf %227, %227 : vector<2x32xf32>
    %cst_80 = arith.constant dense<0.000000e+00> : vector<32xf32>
    %243 = vector.multi_reduction <add>, %242, %cst_80 [0] : vector<2x32xf32> to vector<32xf32>
    %244 = vector.shape_cast %243 : vector<32xf32> to vector<1x32xf32>
    %245 = arith.mulf %241, %241 : vector<1x32xf32>
    %cst_81 = arith.constant 5.000000e-01 : f32
    %246 = vector.broadcast %cst_81 : f32 to vector<1x32xf32>
    %247 = arith.mulf %245, %246 : vector<1x32xf32>
    %248 = arith.subf %244, %247 : vector<1x32xf32>
    %cst_82 = arith.constant 1.000000e+00 : f32
    %249 = vector.broadcast %cst_82 : f32 to vector<1x32xf32>
    %250 = arith.mulf %248, %249 : vector<1x32xf32>
    %cst_83 = arith.constant 9.99999974E-6 : f32
    %251 = vector.broadcast %cst_83 : f32 to vector<1x32xf32>
    %252 = arith.addf %250, %251 : vector<1x32xf32>
    %253 = math.rsqrt %252 : vector<1x32xf32>
    %254 = vector.broadcast %253 : vector<1x32xf32> to vector<2x32xf32>
    %255 = arith.mulf %239, %254 : vector<2x32xf32>
    %c6_i32 = arith.constant 6 : i32
    %256 = arith.index_cast %c6_i32 : i32 to index
    %257 = memref.load %arg0[%256] : memref<8xf32, #tpu.memory_space<smem>>
    %c2_i32_84 = arith.constant 2 : i32
    %258 = arith.muli %c6_i32, %c2_i32_84 : i32
    %259 = arith.index_cast %258 : i32 to index
    %c0_85 = arith.constant 0 : index
    %260 = vector.load %arg9[%259, %c0_85] : memref<16x32xf32, #tpu.memory_space<vmem>>, vector<2x32xf32>
    %cst_86 = arith.constant dense<0.000000e+00> : vector<2x32xf32>
    %261 = tpu.matmul %255, %1, %cst_86 {dimension_numbers = #tpu.dot_dimension_numbers<[1], [0], [0], [1], [0, 0, 1, 1], [], []>} : vector<2x32xf32>, vector<32x32xf32>, vector<2x32xf32> -> vector<2x32xf32>
    %262 = vector.broadcast %257 : f32 to vector<2x32xf32>
    %263 = arith.mulf %262, %261 : vector<2x32xf32>
    %264 = arith.addf %260, %263 : vector<2x32xf32>
    %cst_87 = arith.constant -1.000000e+00 : f32
    %cst_88 = arith.constant 1.000000e+00 : f32
    %265 = vector.broadcast %cst_87 : f32 to vector<2x32xf32>
    %266 = arith.maximumf %265, %264 : vector<2x32xf32>
    %267 = vector.broadcast %cst_88 : f32 to vector<2x32xf32>
    %268 = arith.minimumf %267, %266 : vector<2x32xf32>
    %cst_89 = arith.constant 1.000000e+01 : f32
    %269 = vector.broadcast %cst_89 : f32 to vector<2x32xf32>
    %270 = arith.mulf %269, %268 : vector<2x32xf32>
    %271 = arith.negf %270 : vector<2x32xf32>
    %272 = math.exp %271 : vector<2x32xf32>
    %cst_90 = arith.constant 1.000000e+00 : f32
    %273 = vector.broadcast %cst_90 : f32 to vector<2x32xf32>
    %274 = arith.addf %273, %272 : vector<2x32xf32>
    %275 = arith.divf %273, %274 : vector<2x32xf32>
    %276 = vector.broadcast %3 : vector<1x32xf32> to vector<2x32xf32>
    %277 = arith.mulf %275, %276 : vector<2x32xf32>
    %278 = vector.broadcast %2 : vector<1x32xf32> to vector<2x32xf32>
    %279 = arith.addf %278, %277 : vector<2x32xf32>
    %280 = arith.mulf %268, %279 : vector<2x32xf32>
    %cst_91 = arith.constant dense<0.000000e+00> : vector<32xf32>
    %281 = vector.multi_reduction <add>, %268, %cst_91 [0] : vector<2x32xf32> to vector<32xf32>
    %282 = vector.shape_cast %281 : vector<32xf32> to vector<1x32xf32>
    %283 = arith.mulf %268, %268 : vector<2x32xf32>
    %cst_92 = arith.constant dense<0.000000e+00> : vector<32xf32>
    %284 = vector.multi_reduction <add>, %283, %cst_92 [0] : vector<2x32xf32> to vector<32xf32>
    %285 = vector.shape_cast %284 : vector<32xf32> to vector<1x32xf32>
    %286 = arith.mulf %282, %282 : vector<1x32xf32>
    %cst_93 = arith.constant 5.000000e-01 : f32
    %287 = vector.broadcast %cst_93 : f32 to vector<1x32xf32>
    %288 = arith.mulf %286, %287 : vector<1x32xf32>
    %289 = arith.subf %285, %288 : vector<1x32xf32>
    %cst_94 = arith.constant 1.000000e+00 : f32
    %290 = vector.broadcast %cst_94 : f32 to vector<1x32xf32>
    %291 = arith.mulf %289, %290 : vector<1x32xf32>
    %cst_95 = arith.constant 9.99999974E-6 : f32
    %292 = vector.broadcast %cst_95 : f32 to vector<1x32xf32>
    %293 = arith.addf %291, %292 : vector<1x32xf32>
    %294 = math.rsqrt %293 : vector<1x32xf32>
    %295 = vector.broadcast %294 : vector<1x32xf32> to vector<2x32xf32>
    %296 = arith.mulf %280, %295 : vector<2x32xf32>
    %c7_i32 = arith.constant 7 : i32
    %297 = arith.index_cast %c7_i32 : i32 to index
    %298 = memref.load %arg0[%297] : memref<8xf32, #tpu.memory_space<smem>>
    %c2_i32_96 = arith.constant 2 : i32
    %299 = arith.muli %c7_i32, %c2_i32_96 : i32
    %300 = arith.index_cast %299 : i32 to index
    %c0_97 = arith.constant 0 : index
    %301 = vector.load %arg9[%300, %c0_97] : memref<16x32xf32, #tpu.memory_space<vmem>>, vector<2x32xf32>
    %cst_98 = arith.constant dense<0.000000e+00> : vector<2x32xf32>
    %302 = tpu.matmul %296, %1, %cst_98 {dimension_numbers = #tpu.dot_dimension_numbers<[1], [0], [0], [1], [0, 0, 1, 1], [], []>} : vector<2x32xf32>, vector<32x32xf32>, vector<2x32xf32> -> vector<2x32xf32>
    %303 = vector.broadcast %298 : f32 to vector<2x32xf32>
    %304 = arith.mulf %303, %302 : vector<2x32xf32>
    %305 = arith.addf %301, %304 : vector<2x32xf32>
    %cst_99 = arith.constant -1.000000e+00 : f32
    %cst_100 = arith.constant 1.000000e+00 : f32
    %306 = vector.broadcast %cst_99 : f32 to vector<2x32xf32>
    %307 = arith.maximumf %306, %305 : vector<2x32xf32>
    %308 = vector.broadcast %cst_100 : f32 to vector<2x32xf32>
    %309 = arith.minimumf %308, %307 : vector<2x32xf32>
    %cst_101 = arith.constant 1.000000e+01 : f32
    %310 = vector.broadcast %cst_101 : f32 to vector<2x32xf32>
    %311 = arith.mulf %310, %309 : vector<2x32xf32>
    %312 = arith.negf %311 : vector<2x32xf32>
    %313 = math.exp %312 : vector<2x32xf32>
    %cst_102 = arith.constant 1.000000e+00 : f32
    %314 = vector.broadcast %cst_102 : f32 to vector<2x32xf32>
    %315 = arith.addf %314, %313 : vector<2x32xf32>
    %316 = arith.divf %314, %315 : vector<2x32xf32>
    %317 = vector.broadcast %3 : vector<1x32xf32> to vector<2x32xf32>
    %318 = arith.mulf %316, %317 : vector<2x32xf32>
    %319 = vector.broadcast %2 : vector<1x32xf32> to vector<2x32xf32>
    %320 = arith.addf %319, %318 : vector<2x32xf32>
    %321 = arith.mulf %309, %320 : vector<2x32xf32>
    %cst_103 = arith.constant dense<0.000000e+00> : vector<32xf32>
    %322 = vector.multi_reduction <add>, %309, %cst_103 [0] : vector<2x32xf32> to vector<32xf32>
    %323 = vector.shape_cast %322 : vector<32xf32> to vector<1x32xf32>
    %324 = arith.mulf %309, %309 : vector<2x32xf32>
    %cst_104 = arith.constant dense<0.000000e+00> : vector<32xf32>
    %325 = vector.multi_reduction <add>, %324, %cst_104 [0] : vector<2x32xf32> to vector<32xf32>
    %326 = vector.shape_cast %325 : vector<32xf32> to vector<1x32xf32>
    %327 = arith.mulf %323, %323 : vector<1x32xf32>
    %cst_105 = arith.constant 5.000000e-01 : f32
    %328 = vector.broadcast %cst_105 : f32 to vector<1x32xf32>
    %329 = arith.mulf %327, %328 : vector<1x32xf32>
    %330 = arith.subf %326, %329 : vector<1x32xf32>
    %cst_106 = arith.constant 1.000000e+00 : f32
    %331 = vector.broadcast %cst_106 : f32 to vector<1x32xf32>
    %332 = arith.mulf %330, %331 : vector<1x32xf32>
    %cst_107 = arith.constant 9.99999974E-6 : f32
    %333 = vector.broadcast %cst_107 : f32 to vector<1x32xf32>
    %334 = arith.addf %332, %333 : vector<1x32xf32>
    %335 = math.rsqrt %334 : vector<1x32xf32>
    %336 = vector.broadcast %335 : vector<1x32xf32> to vector<2x32xf32>
    %337 = arith.mulf %321, %336 : vector<2x32xf32>
    %c8_i32 = arith.constant 8 : i32
    %c0_108 = arith.constant 0 : index
    %c0_109 = arith.constant 0 : index
    %338 = vector.load %arg4[%c0_108, %c0_109] : memref<32x5xbf16, #tpu.memory_space<vmem>>, vector<32x5xbf16>
    %339 = arith.extf %338 : vector<32x5xbf16> to vector<32x5xf32>
    %cst_110 = arith.constant dense<0.000000e+00> : vector<2x5xf32>
    %340 = tpu.matmul %337, %339, %cst_110 {dimension_numbers = #tpu.dot_dimension_numbers<[1], [0], [0], [1], [0, 0, 1, 1], [], []>} : vector<2x32xf32>, vector<32x5xf32>, vector<2x5xf32> -> vector<2x5xf32>
    %c0_111 = arith.constant 0 : index
    %c0_112 = arith.constant 0 : index
    %341 = vector.load %arg8[%c0_111, %c0_112] : memref<2x5xf32, #tpu.memory_space<vmem>>, vector<2x5xf32>
    tpu.vector_store %arg8[%c0_111, %c0_112], %340 {strides = array<i32>} : memref<2x5xf32, #tpu.memory_space<vmem>>, vector<2x5xf32>,
    return
  }
}

</mosaic_0001>

<bundles_post_ra>
// kernel: net_forward.1
= control target key start
LH: loop header
LB: loop body
LE: loop exit
PB: predicated region body
PF: predicated region fallthrough
CT: control target
= control target key end

     0   :  { %13 = vsyncpa [#allocation5], 0  ;;  %s1664_s0 = inlined_call_operand.vmem [shape: f32[8], index: 0, kind: input, shape index: {}]   ;;  %s1665_s1 = inlined_call_operand.vmem [shape: f32[16,2], index: 1, kind: input, shape index: {}]   ;;  %s1666_s2 = inlined_call_operand.vmem [shape: bf16[2,32], index: 2, kind: input, shape index: {}]   ;;  %s1667_s3 = inlined_call_operand.vmem [shape: bf16[32,32], index: 3, kind: input, shape index: {}]   ;;  %s1668_s4 = inlined_call_operand.vmem [shape: bf16[32,5], index: 4, kind: input, shape index: {}]   ;;  %s1669_s5 = inlined_call_operand.vmem [shape: f32[1,32], index: 5, kind: input, shape index: {}]   ;;  %s1670_s6 = inlined_call_operand.vmem [shape: f32[1,32], index: 6, kind: input, shape index: {}]   ;;  %s1671_s7 = inlined_call_operand.vmem [shape: f32[1,32], index: 7, kind: input, shape index: {}]   ;;  %s1672_s8 = inlined_call_operand.hbm [shape: f32[2,5], index: 8, kind: output, shape index: {}]  }
   0x1   :  { %14 = vsyncpa [#allocation4], 0  ;;  %s21_s29 = sshll.u32 %s1664_s0, 4  ;;  %s22_s29 = int_to_ptr.vmem [resolvable:$true] %s21_s29 }
   0x2   :  { %s1403_s30 = scalar_lea.vmem %s22_s29, 16  ;;  %p1408_p1 = scmp.lt.s32.totalorder %s22_s29, %s22_s29 }
   0x3   :  { %p1404_p0 = scmp.ne.s32.totalorder %s22_s29, %s1403_s30  ;;  %p1409_p2 = scmp.lt.s32.totalorder %s1403_s30, %s1403_s30 }
   0x5   :  { %p1410_p3 = por %p1409_p2, %p1408_p1 }
   0x7   :  { %p1411_p4 = pnand %p1410_p3, %p1404_p0 }
   0x9   :  { %1414 = shalt.err (!%p1411_p4)
}
   0xa   :  { %s1439_s9 = smov [#allocation3]  }
   0xb   :  { %24 = dma.vmem_to_smem %s22_s29, 16, %s1439_s9, [#allocation5]  }
   0xc   :  { %1435 = dma.done.wait [#allocation5], 16  }
   0xd   :  { %1436 = vsyncadd [#allocation5], 4294967280 }
   0xe   :  { %42 = sfence }
   0xf   :  { %v55_v0 = vld [vmem:[%s1666_s2] sm:$0x1]  ;;  %vm64_vm0 = vcmask 1041408   ;;  %vm57_vm1 = vcmask 15360   ;;  %v1440_v3 = vmov 0.0   ;;  %v1197_v4 = vld [vmem:[%s1667_s3 + $0x8] sm:$0xff]  }
  0x10   :  { %v53_v1 = vld [vmem:[%s1665_s1] sm:$0xff]  ;;  %v56_v2 = vunpack.c.l.bf16 %v55_v0  ;;  %1252 = vmatprep.subr.mxu1 %v1440_v3  ;;  %v1505_v6 = vunpack.c.h.bf16 %v1197_v4  ;;  %v54_v7 = vld [vmem:[%s1665_s1 + $0x8] sm:$0xff]  ;;  %v1510_v8 = vunpack.c.l.bf16 %v1197_v4  ;;  %vm1441_vm2 = vmmov 0   ;;  %s146_s1 = sld [smem:[#allocation3]] }
  0x11   :  { %1249 = vmatprep.mubr.msk.f32.mxu0 %vm57_vm1, %v53_v1  ;;  %v1182_v5 = vld [vmem:[%s1667_s3] sm:$0xff]   ;;  %1260 = vmatprep.mubr.msk.f32.mxu1 %vm1441_vm2, %v1440_v3  ;;  %vm143_vm3 = vcmask 261120   ;;  %vm248_vm4 = vcmask 254976   ;;  %s1160_s20 = sld [smem:[#allocation3 + $0x3]]  ;;  %vm1128_vm5 = vcmask 33792  }
  0x12   :  { %1247 = vmatprep.subr.msk.mxu0 %vm64_vm0, %v56_v2  ;;  %1253 = vmatpush3.msra.mxu1 %v1505_v6  ;;  %v1515_v9 = vunpack.c.h.bf16 %v1182_v5  ;;  %v1520_v10 = vunpack.c.l.bf16 %v1182_v5  ;;  %v1556_v43 = vld [vmem:[%s1670_s6] ss:$0 sm:$0xff]  ;;  %s1156_s6 = sld [smem:[#allocation3 + $0x2]] }
  0x13   :  { %1248 = vmatpush3.msk.msra.mxu0 %vm64_vm0, %v56_v2  ;;  %1254 = vmatprep.subr.mxu1 %v1440_v3  ;;  %v1561_v45 = vld [vmem:[%s1669_s5] ss:$0 sm:$0xff]  ;;  %s1152_s5 = sld [smem:[#allocation3 + $0x1]] }
  0x14   :  { %1250 = vmatmul.mubr.msk.f32.vlgmr.msra.gmra.mxu0 %vm57_vm1, %v54_v7  ;;  %1255 = vmatpush3.msra.mxu1 %v1510_v8  ;;  %s1164_s21 = sld [smem:[#allocation3 + $0x4]] }
  0x15   :  { %1263 = vmatprep.subr.mxu0 %v1440_v3  ;;  %1256 = vmatprep.subr.mxu1 %v1440_v3  ;;  %s1168_s22 = sld [smem:[#allocation3 + $0x5]] }
  0x16   :  { %1264 = vmatpush3.msra.mxu0 %v1505_v6  ;;  %1257 = vmatpush3.msra.mxu1 %v1515_v9  ;;  %v221_v13 = vstv %s146_s1  ;;  %s1172_s23 = sld [smem:[#allocation3 + $0x6]] }
  0x17   :  { %1265 = vmatprep.subr.mxu0 %v1440_v3  ;;  %1258 = vmatprep.subr.mxu1 %v1440_v3  ;;  %s1176_s28 = sld [smem:[#allocation3 + $0x7]] }
  0x18   :  { %1266 = vmatpush3.msra.mxu0 %v1510_v8  ;;  %1259 = vmatpush3.msra.mxu1 %v1520_v10 }
  0x19   :  { %1267 = vmatprep.subr.mxu0 %v1440_v3  ;;  %1261 = vmatmul.mubr.f32.vlgmr.msra.gmra.mxu1 %v1440_v3  ;;  %v345_v51 = vstv %s1152_s5 }
  0x1a   :  { %1268 = vmatpush3.msra.mxu0 %v1515_v9  ;;  %1271 = vmatprep.mubr.msk.f32.mxu0 %vm1441_vm2, %v1440_v3 }
  0x1b   :  { %1269 = vmatprep.subr.mxu0 %v1440_v3  ;;  %1274 = vmatprep.subr.mxu1 %v1440_v3 }
  0x1c   :  { %1270 = vmatpush3.msra.mxu0 %v1520_v10  ;;  %1275 = vmatpush3.msra.mxu1 %v1505_v6 }
  0x1d   :  { %1282 = vmatprep.mubr.msk.f32.mxu1 %vm1441_vm2, %v1440_v3  ;;  %1276 = vmatprep.subr.mxu1 %v1440_v3 }
  0x1e   :  { %1285 = vmatprep.subr.mxu0 %v1440_v3  ;;  %1277 = vmatpush3.msra.mxu1 %v1510_v8 }
  0x1f   :  { %1278 = vmatprep.subr.mxu1 %v1440_v3 }
  0x20   :  { %1279 = vmatpush3.msra.mxu1 %v1515_v9 }
  0x21   :  { %1280 = vmatprep.subr.mxu1 %v1440_v3 }
  0x22   :  { %1281 = vmatpush3.msra.mxu1 %v1520_v10 }
  0x23   :  { %1296 = vmatprep.subr.mxu1 %v1440_v3 }
  0xd4   :  { %v1251_v11 = vpop.f32.mrf.mxu0 }
  0xd5   :  { %145 = vst.msk [vmem:[#allocation2 + $0x8] sm:$0xff] %vm143_vm3, %v1251_v11 }
  0xd6   :  { %v134_v12 = vpop.f32.mrf.mxu0 }
  0xd7   :  { %144 = vst.msk [vmem:[#allocation2] sm:$0xff] %vm143_vm3, %v134_v12 }
  0xd9   :  { %v217_v14 = vpop.f32.mrf.mxu1 }
  0xda   :  { %v222_v15 = vmul.f32 %v221_v13, %v217_v14 }
  0xdb   :  { %v1262_v16 = vpop.f32.mrf.mxu1 }
  0xde   :  { %v147_v17 = vld [vmem:[#allocation2] sm:$0x3]  ;;  %v271_v54 = vld [vmem:[#allocation2 + $0x2] sm:$0x3] }
  0xdf   :  { %v223_v18 = vadd.f32 %v222_v15, %v147_v17 }
  0xe1   :  { %v1148_v19 = vclamps-f32 %v223_v18, 1.0 }
  0xe3   :  { %v1149_v20 = vmul.f32 -10.0, %v1148_v19  ;;  %v249_v21 = vsel %vm248_vm4, %v1148_v19, 0.0  ;;  %v256_v22 = vmul.f32 %v1148_v19, %v1148_v19 }
  0xe4   :  { %v250_v23 = vrot.slane %v249_v21, 4 }
  0xe5   :  { %v228_v24 = vmul.f32 1.442695, %v1149_v20  ;;  %v257_v25 = vsel %vm248_vm4, %v256_v22, 0.0 }
  0xe6   :  { %v251_v26 = vadd.f32 %v250_v23, %v249_v21  ;;  %v258_v27 = vrot.slane %v257_v25, 4 }
  0xe7   :  { %1355 = vpow2.f32 %v228_v24 }
  0xe8   :  { %v252_v28 = vrot.slane %v251_v26, 2  ;;  %v259_v29 = vadd.f32 %v258_v27, %v257_v25 }
  0xea   :  { %v253_v30 = vadd.f32 %v252_v28, %v251_v26  ;;  %v260_v31 = vrot.slane %v259_v29, 2  ;;  %v456_v28 = vstv %s1156_s6 }
  0xec   :  { %v254_v32 = vrot.slane %v253_v30, 1  ;;  %v261_v33 = vadd.f32 %v260_v31, %v259_v29  ;;  %v382_v31 = vld [vmem:[#allocation2 + $0x4] sm:$0x3] }
  0xee   :  { %v255_v34 = vadd.f32 %v254_v32, %v253_v30  ;;  %v262_v35 = vrot.slane %v261_v33, 1 }
  0xf0   :  { %v264_v36 = vmul.f32 %v255_v34, %v255_v34  ;;  %v263_v38 = vadd.f32 %v262_v35, %v261_v33 }
  0xf2   :  { %v265_v37 = vmul.f32 0.5, %v264_v36 }
  0xf4   :  { %v1356_v39 = vpop.eup %1355  ;;  %v266_v41 = vsub.f32 %v263_v38, %v265_v37 }
  0xf5   :  { %v230_v40 = vadd.f32 1.0, %v1356_v39 }
  0xf6   :  { %v267_v42 = vadd.f32 1e-05, %v266_v41 }
  0xf7   :  { %1357 = vrcp.f32 %v230_v40 }
  0xf8   :  { %1359 = vrsqrt.f32 %v267_v42 }
 0x104   :  { %v1358_v44 = vpop.eup %1357 }
 0x105   :  { %v239_v46 = vmul.f32 %v1358_v44, %v1556_v43  ;;  %v1360_v49 = vpop.eup %1359 }
 0x107   :  { %v246_v47 = vadd.f32 %v1561_v45, %v239_v46 }
 0x109   :  { %v247_v48 = vmul.f32 %v1148_v19, %v246_v47 }
 0x10b   :  { %v269_v50 = vmul.f32 %v1360_v49, %v247_v48 }
 0x10d   :  { %1272 = vmatmul.mubr.msk.f32.vlgmr.msra.gmra.mxu0 %vm143_vm3, %v269_v50 }
 0x10e   :  { %1286 = vmatpush3.msra.mxu0 %v1505_v6  ;;  %1293 = vmatprep.mubr.msk.f32.mxu0 %vm1441_vm2, %v1440_v3 }
 0x10f   :  { %1287 = vmatprep.subr.mxu0 %v1440_v3 }
 0x110   :  { %1288 = vmatpush3.msra.mxu0 %v1510_v8 }
 0x111   :  { %1289 = vmatprep.subr.mxu0 %v1440_v3 }
 0x112   :  { %1290 = vmatpush3.msra.mxu0 %v1515_v9 }
 0x113   :  { %1291 = vmatprep.subr.mxu0 %v1440_v3 }
 0x114   :  { %1292 = vmatpush3.msra.mxu0 %v1520_v10 }
 0x115   :  { %1307 = vmatprep.subr.mxu0 %v1440_v3 }
 0x1cd   :  { %v341_v52 = vpop.f32.mrf.mxu0 }
 0x1ce   :  { %v346_v53 = vmul.f32 %v345_v51, %v341_v52 }
 0x1cf   :  { %v1273_v55 = vpop.f32.mrf.mxu0 }
 0x1d0   :  { %v347_v56 = vadd.f32 %v346_v53, %v271_v54 }
 0x1d2   :  { %v1154_v57 = vclamps-f32 %v347_v56, 1.0 }
 0x1d4   :  { %v1155_v58 = vmul.f32 -10.0, %v1154_v57  ;;  %v360_v59 = vsel %vm248_vm4, %v1154_v57, 0.0  ;;  %v367_v60 = vmul.f32 %v1154_v57, %v1154_v57 }
 0x1d5   :  { %v361_v61 = vrot.slane %v360_v59, 4 }
 0x1d6   :  { %v352_v62 = vmul.f32 1.442695, %v1155_v58  ;;  %v368_v63 = vsel %vm248_vm4, %v367_v60, 0.0 }
 0x1d7   :  { %v362_v0 = vadd.f32 %v361_v61, %v360_v59  ;;  %v369_v1 = vrot.slane %v368_v63, 4 }
 0x1d8   :  { %1361 = vpow2.f32 %v352_v62 }
 0x1d9   :  { %v363_v2 = vrot.slane %v362_v0, 2  ;;  %v370_v4 = vadd.f32 %v369_v1, %v368_v63 }
 0x1db   :  { %v364_v5 = vadd.f32 %v363_v2, %v362_v0  ;;  %v371_v7 = vrot.slane %v370_v4, 2  ;;  %v567_v2 = vstv %s1160_s20 }
 0x1dd   :  { %v365_v11 = vrot.slane %v364_v5, 1  ;;  %v372_v12 = vadd.f32 %v371_v7, %v370_v4  ;;  %v493_v7 = vld [vmem:[#allocation2 + $0x6] sm:$0x3] }
 0x1df   :  { %v366_v13 = vadd.f32 %v365_v11, %v364_v5  ;;  %v373_v14 = vrot.slane %v372_v12, 1 }
 0x1e1   :  { %v375_v15 = vmul.f32 %v366_v13, %v366_v13  ;;  %v374_v17 = vadd.f32 %v373_v14, %v372_v12 }
 0x1e3   :  { %v376_v16 = vmul.f32 0.5, %v375_v15 }
 0x1e5   :  { %v1362_v18 = vpop.eup %1361  ;;  %v377_v20 = vsub.f32 %v374_v17, %v376_v16 }
 0x1e6   :  { %v354_v19 = vadd.f32 1.0, %v1362_v18 }
 0x1e7   :  { %v378_v21 = vadd.f32 1e-05, %v377_v20 }
 0x1e8   :  { %1363 = vrcp.f32 %v354_v19 }
 0x1e9   :  { %1365 = vrsqrt.f32 %v378_v21 }
 0x1f5   :  { %v1364_v22 = vpop.eup %1363 }
 0x1f6   :  { %v357_v23 = vmul.f32 %v1364_v22, %v1556_v43  ;;  %v1366_v26 = vpop.eup %1365 }
 0x1f8   :  { %v358_v24 = vadd.f32 %v1561_v45, %v357_v23 }
 0x1fa   :  { %v359_v25 = vmul.f32 %v1154_v57, %v358_v24 }
 0x1fc   :  { %v380_v27 = vmul.f32 %v1366_v26, %v359_v25 }
 0x1fe   :  { %1283 = vmatmul.mubr.msk.f32.vlgmr.msra.gmra.mxu1 %vm143_vm3, %v380_v27 }
 0x1ff   :  { %1297 = vmatpush3.msra.mxu1 %v1505_v6  ;;  %1304 = vmatprep.mubr.msk.f32.mxu1 %vm1441_vm2, %v1440_v3 }
 0x200   :  { %1298 = vmatprep.subr.mxu1 %v1440_v3 }
 0x201   :  { %1299 = vmatpush3.msra.mxu1 %v1510_v8 }
 0x202   :  { %1300 = vmatprep.subr.mxu1 %v1440_v3 }
 0x203   :  { %1301 = vmatpush3.msra.mxu1 %v1515_v9 }
 0x204   :  { %1302 = vmatprep.subr.mxu1 %v1440_v3 }
 0x205   :  { %1303 = vmatpush3.msra.mxu1 %v1520_v10 }
 0x206   :  { %1318 = vmatprep.subr.mxu1 %v1440_v3 }
 0x2be   :  { %v452_v29 = vpop.f32.mrf.mxu1 }
 0x2bf   :  { %v457_v30 = vmul.f32 %v456_v28, %v452_v29 }
 0x2c0   :  { %v1284_v32 = vpop.f32.mrf.mxu1 }
 0x2c1   :  { %v458_v33 = vadd.f32 %v457_v30, %v382_v31 }
 0x2c3   :  { %v1158_v34 = vclamps-f32 %v458_v33, 1.0 }
 0x2c5   :  { %v1159_v35 = vmul.f32 -10.0, %v1158_v34  ;;  %v471_v36 = vsel %vm248_vm4, %v1158_v34, 0.0  ;;  %v478_v37 = vmul.f32 %v1158_v34, %v1158_v34 }
 0x2c6   :  { %v472_v38 = vrot.slane %v471_v36, 4 }
 0x2c7   :  { %v463_v39 = vmul.f32 1.442695, %v1159_v35  ;;  %v479_v40 = vsel %vm248_vm4, %v478_v37, 0.0 }
 0x2c8   :  { %v473_v41 = vadd.f32 %v472_v38, %v471_v36  ;;  %v480_v42 = vrot.slane %v479_v40, 4 }
 0x2c9   :  { %1367 = vpow2.f32 %v463_v39 }
 0x2ca   :  { %v474_v44 = vrot.slane %v473_v41, 2  ;;  %v481_v46 = vadd.f32 %v480_v42, %v479_v40 }
 0x2cc   :  { %v475_v47 = vadd.f32 %v474_v44, %v473_v41  ;;  %v482_v48 = vrot.slane %v481_v46, 2  ;;  %v678_v44 = vstv %s1164_s21 }
 0x2ce   :  { %v476_v49 = vrot.slane %v475_v47, 1  ;;  %v483_v50 = vadd.f32 %v482_v48, %v481_v46  ;;  %v604_v48 = vld [vmem:[#allocation2 + $0x8] sm:$0x3] }
 0x2d0   :  { %v477_v51 = vadd.f32 %v476_v49, %v475_v47  ;;  %v484_v52 = vrot.slane %v483_v50, 1 }
 0x2d2   :  { %v486_v53 = vmul.f32 %v477_v51, %v477_v51  ;;  %v485_v55 = vadd.f32 %v484_v52, %v483_v50 }
 0x2d4   :  { %v487_v54 = vmul.f32 0.5, %v486_v53 }
 0x2d6   :  { %v1368_v56 = vpop.eup %1367  ;;  %v488_v58 = vsub.f32 %v485_v55, %v487_v54 }
 0x2d7   :  { %v465_v57 = vadd.f32 1.0, %v1368_v56 }
 0x2d8   :  { %v489_v59 = vadd.f32 1e-05, %v488_v58 }
 0x2d9   :  { %1369 = vrcp.f32 %v465_v57 }
 0x2da   :  { %1371 = vrsqrt.f32 %v489_v59 }
 0x2e6   :  { %v1370_v60 = vpop.eup %1369 }
 0x2e7   :  { %v468_v61 = vmul.f32 %v1370_v60, %v1556_v43  ;;  %v1372_v0 = vpop.eup %1371 }
 0x2e9   :  { %v469_v62 = vadd.f32 %v1561_v45, %v468_v61 }
 0x2eb   :  { %v470_v63 = vmul.f32 %v1158_v34, %v469_v62 }
 0x2ed   :  { %v491_v1 = vmul.f32 %v1372_v0, %v470_v63 }
 0x2ef   :  { %1294 = vmatmul.mubr.msk.f32.vlgmr.msra.gmra.mxu0 %vm143_vm3, %v491_v1 }
 0x2f0   :  { %1308 = vmatpush3.msra.mxu0 %v1505_v6  ;;  %1315 = vmatprep.mubr.msk.f32.mxu0 %vm1441_vm2, %v1440_v3 }
 0x2f1   :  { %1309 = vmatprep.subr.mxu0 %v1440_v3 }
 0x2f2   :  { %1310 = vmatpush3.msra.mxu0 %v1510_v8 }
 0x2f3   :  { %1311 = vmatprep.subr.mxu0 %v1440_v3 }
 0x2f4   :  { %1312 = vmatpush3.msra.mxu0 %v1515_v9 }
 0x2f5   :  { %1313 = vmatprep.subr.mxu0 %v1440_v3 }
 0x2f6   :  { %1314 = vmatpush3.msra.mxu0 %v1520_v10 }
 0x2f7   :  { %1329 = vmatprep.subr.mxu0 %v1440_v3 }
 0x3af   :  { %v563_v4 = vpop.f32.mrf.mxu0 }
 0x3b0   :  { %v568_v5 = vmul.f32 %v567_v2, %v563_v4 }
 0x3b1   :  { %v1295_v11 = vpop.f32.mrf.mxu0 }
 0x3b2   :  { %v569_v12 = vadd.f32 %v568_v5, %v493_v7 }
 0x3b4   :  { %v1162_v13 = vclamps-f32 %v569_v12, 1.0 }
 0x3b6   :  { %v1163_v14 = vmul.f32 -10.0, %v1162_v13  ;;  %v582_v15 = vsel %vm248_vm4, %v1162_v13, 0.0  ;;  %v589_v16 = vmul.f32 %v1162_v13, %v1162_v13 }
 0x3b7   :  { %v583_v17 = vrot.slane %v582_v15, 4 }
 0x3b8   :  { %v574_v18 = vmul.f32 1.442695, %v1163_v14  ;;  %v590_v19 = vsel %vm248_vm4, %v589_v16, 0.0 }
 0x3b9   :  { %v584_v20 = vadd.f32 %v583_v17, %v582_v15  ;;  %v591_v21 = vrot.slane %v590_v19, 4 }
 0x3ba   :  { %1373 = vpow2.f32 %v574_v18 }
 0x3bb   :  { %v585_v22 = vrot.slane %v584_v20, 2  ;;  %v592_v23 = vadd.f32 %v591_v21, %v590_v19 }
 0x3bd   :  { %v586_v24 = vadd.f32 %v585_v22, %v584_v20  ;;  %v593_v25 = vrot.slane %v592_v23, 2  ;;  %v789_v22 = vstv %s1168_s22 }
 0x3bf   :  { %v587_v26 = vrot.slane %v586_v24, 1  ;;  %v594_v27 = vadd.f32 %v593_v25, %v592_v23 }
 0x3c1   :  { %v588_v28 = vadd.f32 %v587_v26, %v586_v24  ;;  %v595_v29 = vrot.slane %v594_v27, 1 }
 0x3c3   :  { %v597_v30 = vmul.f32 %v588_v28, %v588_v28  ;;  %v596_v32 = vadd.f32 %v595_v29, %v594_v27 }
 0x3c5   :  { %v598_v31 = vmul.f32 0.5, %v597_v30 }
 0x3c7   :  { %v1374_v33 = vpop.eup %1373  ;;  %v599_v35 = vsub.f32 %v596_v32, %v598_v31 }
 0x3c8   :  { %v576_v34 = vadd.f32 1.0, %v1374_v33 }
 0x3c9   :  { %v600_v36 = vadd.f32 1e-05, %v599_v35 }
 0x3ca   :  { %1375 = vrcp.f32 %v576_v34 }
 0x3cb   :  { %1377 = vrsqrt.f32 %v600_v36 }
 0x3d7   :  { %v1376_v37 = vpop.eup %1375 }
 0x3d8   :  { %v579_v38 = vmul.f32 %v1376_v37, %v1556_v43  ;;  %v1378_v41 = vpop.eup %1377 }
 0x3da   :  { %v580_v39 = vadd.f32 %v1561_v45, %v579_v38 }
 0x3dc   :  { %v581_v40 = vmul.f32 %v1162_v13, %v580_v39 }
 0x3de   :  { %v602_v42 = vmul.f32 %v1378_v41, %v581_v40 }
 0x3e0   :  { %1305 = vmatmul.mubr.msk.f32.vlgmr.msra.gmra.mxu1 %vm143_vm3, %v602_v42 }
 0x3e1   :  { %1319 = vmatpush3.msra.mxu1 %v1505_v6  ;;  %1326 = vmatprep.mubr.msk.f32.mxu1 %vm1441_vm2, %v1440_v3 }
 0x3e2   :  { %1320 = vmatprep.subr.mxu1 %v1440_v3 }
 0x3e3   :  { %1321 = vmatpush3.msra.mxu1 %v1510_v8 }
 0x3e4   :  { %1322 = vmatprep.subr.mxu1 %v1440_v3 }
 0x3e5   :  { %1323 = vmatpush3.msra.mxu1 %v1515_v9 }
 0x3e6   :  { %1324 = vmatprep.subr.mxu1 %v1440_v3 }
 0x3e7   :  { %1325 = vmatpush3.msra.mxu1 %v1520_v10 }
 0x3e8   :  { %1340 = vmatprep.subr.mxu1 %v1440_v3 }
 0x4a0   :  { %v674_v46 = vpop.f32.mrf.mxu1 }
 0x4a1   :  { %v679_v47 = vmul.f32 %v678_v44, %v674_v46 }
 0x4a2   :  { %v1306_v49 = vpop.f32.mrf.mxu1 }
 0x4a3   :  { %v680_v50 = vadd.f32 %v679_v47, %v604_v48 }
 0x4a5   :  { %v1166_v51 = vclamps-f32 %v680_v50, 1.0 }
 0x4a7   :  { %v1167_v52 = vmul.f32 -10.0, %v1166_v51  ;;  %v693_v53 = vsel %vm248_vm4, %v1166_v51, 0.0  ;;  %v700_v54 = vmul.f32 %v1166_v51, %v1166_v51 }
 0x4a8   :  { %v694_v55 = vrot.slane %v693_v53, 4 }
 0x4a9   :  { %v685_v56 = vmul.f32 1.442695, %v1167_v52  ;;  %v701_v57 = vsel %vm248_vm4, %v700_v54, 0.0 }
 0x4aa   :  { %v695_v58 = vadd.f32 %v694_v55, %v693_v53  ;;  %v702_v59 = vrot.slane %v701_v57, 4 }
 0x4ab   :  { %1379 = vpow2.f32 %v685_v56  ;;  %v900_v56 = vstv %s1172_s23 }
 0x4ac   :  { %v696_v60 = vrot.slane %v695_v58, 2  ;;  %v703_v61 = vadd.f32 %v702_v59, %v701_v57  ;;  %v826_v59 = vld [vmem:[#allocation2 + $0xc] sm:$0x3] }
 0x4ae   :  { %v697_v62 = vadd.f32 %v696_v60, %v695_v58  ;;  %v704_v63 = vrot.slane %v703_v61, 2 }
 0x4b0   :  { %v698_v0 = vrot.slane %v697_v62, 1  ;;  %v705_v1 = vadd.f32 %v704_v63, %v703_v61 }
 0x4b2   :  { %v699_v2 = vadd.f32 %v698_v0, %v697_v62  ;;  %v706_v4 = vrot.slane %v705_v1, 1 }
 0x4b4   :  { %v708_v5 = vmul.f32 %v699_v2, %v699_v2  ;;  %v707_v11 = vadd.f32 %v706_v4, %v705_v1 }
 0x4b6   :  { %v709_v7 = vmul.f32 0.5, %v708_v5 }
 0x4b8   :  { %v1380_v12 = vpop.eup %1379  ;;  %v710_v14 = vsub.f32 %v707_v11, %v709_v7 }
 0x4b9   :  { %v687_v13 = vadd.f32 1.0, %v1380_v12 }
 0x4ba   :  { %v711_v15 = vadd.f32 1e-05, %v710_v14 }
 0x4bb   :  { %1381 = vrcp.f32 %v687_v13 }
 0x4bc   :  { %1383 = vrsqrt.f32 %v711_v15 }
 0x4c8   :  { %v1382_v16 = vpop.eup %1381 }
 0x4c9   :  { %v690_v17 = vmul.f32 %v1382_v16, %v1556_v43  ;;  %v1384_v20 = vpop.eup %1383 }
 0x4cb   :  { %v691_v18 = vadd.f32 %v1561_v45, %v690_v17 }
 0x4cd   :  { %v692_v19 = vmul.f32 %v1166_v51, %v691_v18 }
 0x4cf   :  { %v713_v21 = vmul.f32 %v1384_v20, %v692_v19 }
 0x4d1   :  { %1316 = vmatmul.mubr.msk.f32.vlgmr.msra.gmra.mxu0 %vm143_vm3, %v713_v21 }
 0x4d2   :  { %1330 = vmatpush3.msra.mxu0 %v1505_v6  ;;  %1337 = vmatprep.mubr.msk.f32.mxu0 %vm1441_vm2, %v1440_v3  ;;  %v715_v6 = vld [vmem:[#allocation2 + $0xa] sm:$0x3] }
 0x4d3   :  { %1331 = vmatprep.subr.mxu0 %v1440_v3 }
 0x4d4   :  { %1332 = vmatpush3.msra.mxu0 %v1510_v8 }
 0x4d5   :  { %1333 = vmatprep.subr.mxu0 %v1440_v3 }
 0x4d6   :  { %1334 = vmatpush3.msra.mxu0 %v1515_v9 }
 0x4d7   :  { %1335 = vmatprep.subr.mxu0 %v1440_v3 }
 0x4d8   :  { %1336 = vmatpush3.msra.mxu0 %v1520_v10 }
 0x591   :  { %v785_v23 = vpop.f32.mrf.mxu0 }
 0x592   :  { %v790_v24 = vmul.f32 %v789_v22, %v785_v23 }
 0x593   :  { %v1317_v25 = vpop.f32.mrf.mxu0 }
 0x594   :  { %v791_v26 = vadd.f32 %v790_v24, %v715_v6 }
 0x596   :  { %v1170_v27 = vclamps-f32 %v791_v26, 1.0 }
 0x598   :  { %v1171_v28 = vmul.f32 -10.0, %v1170_v27  ;;  %v804_v29 = vsel %vm248_vm4, %v1170_v27, 0.0  ;;  %v811_v8 = vmul.f32 %v1170_v27, %v1170_v27 }
 0x599   :  { %v805_v30 = vrot.slane %v804_v29, 4 }
 0x59a   :  { %v796_v31 = vmul.f32 1.442695, %v1171_v28  ;;  %v812_v9 = vsel %vm248_vm4, %v811_v8, 0.0 }
 0x59b   :  { %v806_v32 = vadd.f32 %v805_v30, %v804_v29  ;;  %v813_v33 = vrot.slane %v812_v9, 4 }
 0x59c   :  { %1385 = vpow2.f32 %v796_v31  ;;  %v1198_v31 = vld [vmem:[%s1668_s4 + $0x8] sm:$0xff]  }
 0x59d   :  { %v807_v10 = vrot.slane %v806_v32, 2  ;;  %v814_v34 = vadd.f32 %v813_v33, %v812_v9  ;;  %v1196_v9 = vunpack.c.h.bf16 %v1198_v31  ;;  %v1190_v33 = vld [vmem:[%s1668_s4] sm:$0xff]   ;;  %s1442_s4 = smov [#allocation6]  }
 0x59e   :  { %s1136_s29 = sshll.u32 %s1442_s4, 4  ;;  %s1137_s29 = int_to_ptr.vmem [resolvable:$true] %s1136_s29 }
 0x59f   :  { %v808_v35 = vadd.f32 %v807_v10, %v806_v32  ;;  %v815_v36 = vrot.slane %v814_v34, 2  ;;  %v1195_v32 = vunpack.c.l.bf16 %v1198_v31  ;;  %v1192_v10 = vunpack.c.h.bf16 %v1190_v33  ;;  %s1415_s30 = scalar_lea.vmem %s1137_s29, 32  ;;  %p1420_p6 = scmp.lt.s32.totalorder %s1137_s29, %s1137_s29 }
 0x5a0   :  { %p1416_p5 = scmp.ne.s32.totalorder %s1137_s29, %s1415_s30  ;;  %p1421_p7 = scmp.lt.s32.totalorder %s1415_s30, %s1415_s30 }
 0x5a1   :  { %v809_v37 = vrot.slane %v808_v35, 1  ;;  %v816_v38 = vadd.f32 %v815_v36, %v814_v34  ;;  %v1191_v34 = vunpack.c.l.bf16 %v1190_v33 }
 0x5a2   :  { %p1422_p8 = por %p1421_p7, %p1420_p6 }
 0x5a3   :  { %v810_v39 = vadd.f32 %v809_v37, %v808_v35  ;;  %v817_v40 = vrot.slane %v816_v38, 1  ;;  %v1011_v35 = vstv %s1176_s28 }
 0x5a4   :  { %p1423_p9 = pnand %p1422_p8, %p1416_p5 }
 0x5a5   :  { %v819_v41 = vmul.f32 %v810_v39, %v810_v39  ;;  %v818_v44 = vadd.f32 %v817_v40, %v816_v38  ;;  %v937_v38 = vld [vmem:[#allocation2 + $0xe] sm:$0x3] }
 0x5a7   :  { %v820_v42 = vmul.f32 0.5, %v819_v41 }
 0x5a9   :  { %v1386_v46 = vpop.eup %1385  ;;  %v821_v48 = vsub.f32 %v818_v44, %v820_v42 }
 0x5aa   :  { %v798_v47 = vadd.f32 1.0, %v1386_v46 }
 0x5ab   :  { %v822_v49 = vadd.f32 1e-05, %v821_v48 }
 0x5ac   :  { %1387 = vrcp.f32 %v798_v47 }
 0x5ad   :  { %1389 = vrsqrt.f32 %v822_v49 }
 0x5b9   :  { %v1388_v50 = vpop.eup %1387 }
 0x5ba   :  { %v801_v51 = vmul.f32 %v1388_v50, %v1556_v43  ;;  %v1390_v54 = vpop.eup %1389 }
 0x5bc   :  { %v802_v52 = vadd.f32 %v1561_v45, %v801_v51 }
 0x5be   :  { %v803_v53 = vmul.f32 %v1170_v27, %v802_v52 }
 0x5c0   :  { %v824_v55 = vmul.f32 %v1390_v54, %v803_v53 }
 0x5c2   :  { %1327 = vmatmul.mubr.msk.f32.vlgmr.msra.gmra.mxu1 %vm143_vm3, %v824_v55 }
 0x5c3   :  { %1348 = vmatprep.mubr.msk.f32.mxu1 %vm1441_vm2, %v1440_v3  ;;  %1341 = vmatpush3.msra.mxu1 %v1196_v9 }
 0x5c4   :  { %1342 = vmatprep.subr.mxu1 %v1440_v3 }
 0x5c5   :  { %1343 = vmatpush3.msra.mxu1 %v1195_v32 }
 0x5c6   :  { %1344 = vmatprep.subr.mxu1 %v1440_v3 }
 0x5c7   :  { %1345 = vmatpush3.msra.mxu1 %v1192_v10 }
 0x5c8   :  { %1346 = vmatprep.subr.mxu1 %v1440_v3 }
 0x5c9   :  { %1347 = vmatpush3.msra.mxu1 %v1191_v34 }
 0x682   :  { %v896_v57 = vpop.f32.mrf.mxu1 }
 0x683   :  { %v901_v58 = vmul.f32 %v900_v56, %v896_v57 }
 0x684   :  { %v1328_v60 = vpop.f32.mrf.mxu1 }
 0x685   :  { %v902_v61 = vadd.f32 %v901_v58, %v826_v59 }
 0x687   :  { %v1174_v62 = vclamps-f32 %v902_v61, 1.0 }
 0x689   :  { %v1175_v63 = vmul.f32 -10.0, %v1174_v62  ;;  %v915_v0 = vsel %vm248_vm4, %v1174_v62, 0.0  ;;  %v922_v1 = vmul.f32 %v1174_v62, %v1174_v62 }
 0x68a   :  { %v916_v2 = vrot.slane %v915_v0, 4 }
 0x68b   :  { %v907_v4 = vmul.f32 1.442695, %v1175_v63  ;;  %v923_v5 = vsel %vm248_vm4, %v922_v1, 0.0 }
 0x68c   :  { %v917_v7 = vadd.f32 %v916_v2, %v915_v0  ;;  %v924_v11 = vrot.slane %v923_v5, 4 }
 0x68d   :  { %1391 = vpow2.f32 %v907_v4 }
 0x68e   :  { %v918_v12 = vrot.slane %v917_v7, 2  ;;  %v925_v13 = vadd.f32 %v924_v11, %v923_v5 }
 0x690   :  { %v919_v14 = vadd.f32 %v918_v12, %v917_v7  ;;  %v926_v15 = vrot.slane %v925_v13, 2 }
 0x692   :  { %v920_v16 = vrot.slane %v919_v14, 1  ;;  %v927_v17 = vadd.f32 %v926_v15, %v925_v13 }
 0x694   :  { %v921_v18 = vadd.f32 %v920_v16, %v919_v14  ;;  %v928_v19 = vrot.slane %v927_v17, 1 }
 0x696   :  { %v930_v20 = vmul.f32 %v921_v18, %v921_v18  ;;  %v929_v22 = vadd.f32 %v928_v19, %v927_v17 }
 0x698   :  { %v931_v21 = vmul.f32 0.5, %v930_v20 }
 0x69a   :  { %v1392_v23 = vpop.eup %1391  ;;  %v932_v6 = vsub.f32 %v929_v22, %v931_v21 }
 0x69b   :  { %v909_v24 = vadd.f32 1.0, %v1392_v23 }
 0x69c   :  { %v933_v25 = vadd.f32 1e-05, %v932_v6 }
 0x69d   :  { %1393 = vrcp.f32 %v909_v24 }
 0x69e   :  { %1395 = vrsqrt.f32 %v933_v25 }
 0x6aa   :  { %v1394_v26 = vpop.eup %1393 }
 0x6ab   :  { %v912_v27 = vmul.f32 %v1394_v26, %v1556_v43  ;;  %v1396_v8 = vpop.eup %1395 }
 0x6ad   :  { %v913_v28 = vadd.f32 %v1561_v45, %v912_v27 }
 0x6af   :  { %v914_v29 = vmul.f32 %v1174_v62, %v913_v28 }
 0x6b1   :  { %v935_v30 = vmul.f32 %v1396_v8, %v914_v29 }
 0x6b3   :  { %1338 = vmatmul.mubr.msk.f32.vlgmr.msra.gmra.mxu0 %vm143_vm3, %v935_v30 }
 0x773   :  { %v1007_v36 = vpop.f32.mrf.mxu0 }
 0x774   :  { %v1012_v37 = vmul.f32 %v1011_v35, %v1007_v36 }
 0x775   :  { %v1339_v39 = vpop.f32.mrf.mxu0 }
 0x776   :  { %v1013_v40 = vadd.f32 %v1012_v37, %v937_v38 }
 0x778   :  { %v1178_v41 = vclamps-f32 %v1013_v40, 1.0 }
 0x77a   :  { %v1179_v42 = vmul.f32 -10.0, %v1178_v41  ;;  %v1026_v44 = vsel %vm248_vm4, %v1178_v41, 0.0  ;;  %v1033_v46 = vmul.f32 %v1178_v41, %v1178_v41 }
 0x77b   :  { %v1027_v47 = vrot.slane %v1026_v44, 4 }
 0x77c   :  { %v1018_v48 = vmul.f32 1.442695, %v1179_v42  ;;  %v1034_v49 = vsel %vm248_vm4, %v1033_v46, 0.0 }
 0x77d   :  { %v1028_v50 = vadd.f32 %v1027_v47, %v1026_v44  ;;  %v1035_v51 = vrot.slane %v1034_v49, 4 }
 0x77e   :  { %1397 = vpow2.f32 %v1018_v48 }
 0x77f   :  { %v1029_v3 = vrot.slane %v1028_v50, 2  ;;  %v1036_v52 = vadd.f32 %v1035_v51, %v1034_v49 }
 0x781   :  { %v1030_v53 = vadd.f32 %v1029_v3, %v1028_v50  ;;  %v1037_v54 = vrot.slane %v1036_v52, 2 }
 0x783   :  { %v1031_v55 = vrot.slane %v1030_v53, 1  ;;  %v1038_v56 = vadd.f32 %v1037_v54, %v1036_v52 }
 0x785   :  { %v1032_v57 = vadd.f32 %v1031_v55, %v1030_v53  ;;  %v1039_v58 = vrot.slane %v1038_v56, 1 }
 0x787   :  { %v1041_v59 = vmul.f32 %v1032_v57, %v1032_v57  ;;  %v1040_v61 = vadd.f32 %v1039_v58, %v1038_v56 }
 0x789   :  { %v1042_v60 = vmul.f32 0.5, %v1041_v59 }
 0x78b   :  { %v1398_v62 = vpop.eup %1397  ;;  %v1043_v0 = vsub.f32 %v1040_v61, %v1042_v60 }
 0x78c   :  { %v1020_v63 = vadd.f32 1.0, %v1398_v62 }
 0x78d   :  { %v1044_v1 = vadd.f32 1e-05, %v1043_v0 }
 0x78e   :  { %1399 = vrcp.f32 %v1020_v63 }
 0x78f   :  { %1401 = vrsqrt.f32 %v1044_v1 }
 0x79b   :  { %v1400_v2 = vpop.eup %1399 }
 0x79c   :  { %v1023_v4 = vmul.f32 %v1400_v2, %v1556_v43  ;;  %v1402_v11 = vpop.eup %1401 }
 0x79e   :  { %v1024_v5 = vadd.f32 %v1561_v45, %v1023_v4 }
 0x7a0   :  { %v1025_v7 = vmul.f32 %v1178_v41, %v1024_v5 }
 0x7a2   :  { %v1046_v12 = vmul.f32 %v1402_v11, %v1025_v7 }
 0x7a4   :  { %1349 = vmatmul.mubr.msk.f32.vlgmr.msra.gmra.mxu1 %vm143_vm3, %v1046_v12 }
 0x864   :  { %v1124_v13 = vpop.f32.mrf.mxu1 }
 0x865   :  { %1129 = vst.msk [vmem:[#allocation6] sm:$0x3] %vm1128_vm5, %v1124_v13 }
 0x866   :  { %v1350_v14 = vpop.f32.mrf.mxu1 }
 0x867   :  { %1426 = shalt.err (!%p1423_p9)
}
 0x868   :  { %1139 = dma.vmem_to_hbm [thread:$0]  %s1137_s29, 32, %s1672_s8, [#allocation4]  }
 0x869   :  { %1437 = dma.done.wait [#allocation4], 32  }
 0x86a   :  { %1438 = vsyncadd [#allocation4], 4294967264 }
 0x86b   :  { %1143 = vsyncpa [#allocation4], 1 }
 0x86c   :  { %1144 = vsyncpa [#allocation5], 1 }

</bundles_post_ra>
